<compile_context>
chip_gen: v7x
topology: tpu7x:2x2x1
jax: 0.10.0
libtpu: 0.0.40
codegen_flags: <defaults>
</compile_context>

<pallas_src>
import jax
import jax.numpy as jnp
from jax.experimental import pallas as pl
from jax.experimental.pallas import tpu as pltpu

_LANE = 128


def _normalize_kernel(mean_ref, inv_std_ref, img_ref, out_ref):
    # mean_ref / inv_std_ref: (C,) f32 in SMEM (scalar-prefetched).
    # img_ref / out_ref:      (tile_n, 1, tile_r, 128) VMEM blocks.
    c = pl.program_id(1)                  # channel handled by this grid step
    m = mean_ref[c]                       # scalar SMEM reads
    s = inv_std_ref[c]
    x = img_ref[...].astype(jnp.float32)
    out_ref[...] = ((x - m) * s).astype(out_ref.dtype)


def _vmem_budget():
    """Generation-aware scoped-VMEM limit and per-block byte budget."""
    try:
        cap = int(pltpu.get_tpu_info().vmem_capacity_bytes)
    except Exception:
        cap = 64 << 20                    # conservative fallback (v7x-sized)
    limit = int(min(0.75 * cap, 96 << 20))     # 96 MiB on v5e/v6e, 48 MiB on v7x
    per_block = max(1 << 20, limit // 6)       # in+out double-buffered = 4 blocks
    return limit, per_block


def _choose_tiles(N, C, R, itemsize, per_block_bytes):
    """Pick (tile_n, tile_r) for blocks of shape (tile_n, 1, tile_r, 128)."""
    lane_bytes = _LANE * itemsize
    slab_bytes = max(R * lane_bytes, 1)        # one full (n, c) channel slab
    tile_n = max(1, min(N, per_block_bytes // slab_bytes))
    rows_budget = max(1, per_block_bytes // (tile_n * lane_bytes))
    if R <= 8 or rows_budget >= R:
        tile_r = R                             # full dim: always legal
    else:
        tile_r = max(8, (min(rows_budget, R) // 8) * 8)

    # Guarantee >= 2 grid steps so v7x megacore sharding has work to split.
    steps = pl.cdiv(N, tile_n) * C * pl.cdiv(R, tile_r)
    if steps < 2:
        if R > 8:
            tile_r = max(8, ((R // 2 + 7) // 8) * 8)
        elif N >= 2:
            tile_n = max(1, N // 2)
    return tile_n, tile_r


def normalization_forward(img, mean, std):
    """img: (N, C, H, W); mean, std: (C,).  Returns (img - mean) / std (NCHW)."""
    N, C, H, W = img.shape
    HW = H * W
    itemsize = jnp.dtype(img.dtype).itemsize

    # Per-channel parameters (C floats each) — live in SMEM inside the kernel.
    mean_f = mean.astype(jnp.float32).reshape(C)
    inv_std_f = (1.0 / std.astype(jnp.float32)).reshape(C)

    # Lane-dense layout: (N, C, R, 128).  Pad HW to a multiple of 128 if needed.
    x = img.reshape(N, C, HW)
    HWp = ((HW + _LANE - 1) // _LANE) * _LANE
    if HWp != HW:
        x = jnp.pad(x, ((0, 0), (0, 0), (0, HWp - HW)))
    R = HWp // _LANE
    x4 = x.reshape(N, C, R, _LANE)

    vmem_limit, per_block = _vmem_budget()
    tile_n, tile_r = _choose_tiles(N, C, R, itemsize, per_block)
    grid = (pl.cdiv(N, tile_n), C, pl.cdiv(R, tile_r))

    block = (tile_n, 1, tile_r, _LANE)
    img_spec = pl.BlockSpec(block, lambda n, c, r, mean_s, inv_s: (n, c, r, 0))
    out_spec = pl.BlockSpec(block, lambda n, c, r, mean_s, inv_s: (n, c, r, 0))

    out = pl.pallas_call(
        _normalize_kernel,
        out_shape=jax.ShapeDtypeStruct((N, C, R, _LANE), img.dtype),
        grid_spec=pltpu.PrefetchScalarGridSpec(
            num_scalar_prefetch=2,
            grid=grid,
            in_specs=[img_spec],
            out_specs=out_spec,
        ),
        compiler_params=pltpu.CompilerParams(
            dimension_semantics=("parallel", "parallel", "parallel"),
            vmem_limit_bytes=vmem_limit,
        ),
    )(mean_f, inv_std_f, x4)

    out = out.reshape(N, C, HWp)
    if HWp != HW:
        out = out[:, :, :HW]
    return out.reshape(N, C, H, W)


if __name__ == "__main__":
    key = jax.random.PRNGKey(0)
    k_img, k_mean, k_std = jax.random.split(key, 3)

    N, C, H, W = 2, 4, 16, 16
    img = jax.random.normal(k_img, (N, C, H, W), dtype=jnp.float32)
    # Deterministic "parameters" analogous to the mean/std tensors in __init__.
    mean = jax.random.uniform(k_mean, (C,), dtype=jnp.float32, minval=0.2, maxval=0.6)
    std = jax.random.uniform(k_std, (C,), dtype=jnp.float32, minval=0.1, maxval=0.4)

    out = jax.block_until_ready(normalization_forward(img, mean, std))

    # Reference check (plain JAX, mirrors PyTorch broadcasting).
    ref = (img - mean.reshape(-1, 1, 1)) / std.reshape(-1, 1, 1)
    assert jnp.allclose(out, ref, atol=1e-6, rtol=1e-5), float(
        jnp.max(jnp.abs(out - ref))
    )

    print("KERNEL_OK")
</pallas_src>

<mosaic_0001>
module attributes {stable_mosaic.version = 11 : i64} {
  func.func @_normalize_kernel(%arg0: i32, %arg1: i32, %arg2: i32, %arg3: memref<4xf32, #tpu.memory_space<smem>>, %arg4: memref<4xf32, #tpu.memory_space<smem>>, %arg5: memref<2x1x2x128xf32, #tpu.memory_space<vmem>>, %arg6: memref<2x1x2x128xf32, #tpu.memory_space<vmem>>) attributes {dimension_semantics = [#tpu.dimension_semantics<parallel>, #tpu.dimension_semantics<parallel>, #tpu.dimension_semantics<parallel>], iteration_bounds = array<i64: 1, 4, 1>, scalar_prefetch = 2 : i64, scratch_operands = 0 : i64, tpu.core_type = #tpu.core_type<tc>, window_params = [{transform_indices = @transform_0, window_bounds = array<i64: 2, 1, 2, 128>}, {transform_indices = @transform_1, window_bounds = array<i64: 2, 1, 2, 128>}]} {
    %0 = arith.index_cast %arg1 : i32 to index
    %1 = memref.load %arg3[%0] : memref<4xf32, #tpu.memory_space<smem>>
    %2 = arith.index_cast %arg1 : i32 to index
    %3 = memref.load %arg4[%2] : memref<4xf32, #tpu.memory_space<smem>>
    %c0 = arith.constant 0 : index
    %c0_0 = arith.constant 0 : index
    %c0_1 = arith.constant 0 : index
    %c0_2 = arith.constant 0 : index
    %4 = vector.load %arg5[%c0, %c0_0, %c0_1, %c0_2] : memref<2x1x2x128xf32, #tpu.memory_space<vmem>>, vector<2x1x2x128xf32>
    %5 = vector.broadcast %1 : f32 to vector<2x1x2x128xf32>
    %6 = arith.subf %4, %5 : vector<2x1x2x128xf32>
    %7 = vector.broadcast %3 : f32 to vector<2x1x2x128xf32>
    %8 = arith.mulf %6, %7 : vector<2x1x2x128xf32>
    %c0_3 = arith.constant 0 : index
    %c0_4 = arith.constant 0 : index
    %c0_5 = arith.constant 0 : index
    %c0_6 = arith.constant 0 : index
    %9 = vector.load %arg6[%c0_3, %c0_4, %c0_5, %c0_6] : memref<2x1x2x128xf32, #tpu.memory_space<vmem>>, vector<2x1x2x128xf32>
    tpu.vector_store %arg6[%c0_3, %c0_4, %c0_5, %c0_6], %8 {strides = array<i32>} : memref<2x1x2x128xf32, #tpu.memory_space<vmem>>, vector<2x1x2x128xf32>,
    return
  }
  func.func @transform_0(%arg0: i32, %arg1: i32, %arg2: i32, %arg3: memref<4xf32, #tpu.memory_space<smem>>, %arg4: memref<4xf32, #tpu.memory_space<smem>>) -> (i32, i32, i32, i32) {
    %c0_i32 = arith.constant 0 : i32
    %c0_i32_0 = arith.constant 0 : i32
    return %arg0, %arg1, %arg2, %c0_i32 : i32, i32, i32, i32
  }
  func.func @transform_1(%arg0: i32, %arg1: i32, %arg2: i32, %arg3: memref<4xf32, #tpu.memory_space<smem>>, %arg4: memref<4xf32, #tpu.memory_space<smem>>) -> (i32, i32, i32, i32) {
    %c0_i32 = arith.constant 0 : i32
    %c0_i32_0 = arith.constant 0 : i32
    return %arg0, %arg1, %arg2, %c0_i32 : i32, i32, i32, i32
  }
}

</mosaic_0001>

<bundles_post_ra>
// kernel: tpu_custom_call.1
= control target key start
LH: loop header
LB: loop body
LE: loop exit
PB: predicated region body
PF: predicated region fallthrough
CT: control target
= control target key end

     0   :  { %s735_s0 = inlined_call_operand.hbm [shape: f32[4], index: 0, kind: input, shape index: {}]   ;;  %s736_s2 = inlined_call_operand.hbm [shape: f32[2,4,2,128], index: 2, kind: input, shape index: {}]   ;;  %s737_s3 = inlined_call_operand.hbm [shape: f32[2,4,2,128], index: 3, kind: output, shape index: {}]   ;;  %s738_s1 = inlined_call_operand.vmem [shape: f32[4], index: 1, kind: input, shape index: {}]  }
   0x1   :  { %s379_s14 = scalar_lea.hbm %s735_s0, 16 }
   0x2   :  { %p380_p0 = scmp.ne.s32.totalorder %s735_s0, %s379_s14  ;;  %p383_p1 = scmp.lt.u32.totalorder %s379_s14, %s735_s0 }
   0x4   :  { %p385_p2 = pnand %p383_p1, %p380_p0 }
   0x6   :  { %388 = shalt.err (!%p385_p2)  }
   0x7   :  { %s517_s19 = smov [#allocation3]   ;;  %s10_s24 = sshll.u32 %s738_s1, 4  ;;  %s11_s24 = int_to_ptr.vmem [resolvable:$true] %s10_s24 }
   0x8   :  { %9 = dma.hbm_to_smem %s735_s0, 16, %s517_s19, [#allocation2] }
   0x9   :  { %s389_s25 = scalar_lea.vmem %s11_s24, 16  ;;  %p394_p4 = scmp.lt.s32.totalorder %s11_s24, %s11_s24 }
   0xa   :  { %p390_p3 = scmp.ne.s32.totalorder %s11_s24, %s389_s25  ;;  %p395_p5 = scmp.lt.s32.totalorder %s389_s25, %s389_s25 }
   0xc   :  { %p396_p6 = por %p395_p5, %p394_p4 }
   0xe   :  { %p397_p7 = pnand %p396_p6, %p390_p3 }
  0x10   :  { %400 = shalt.err (!%p397_p7)  }
  0x11   :  { %s518_s26 = smov [#allocation4]  }
  0x12   :  { %13 = dma.vmem_to_smem %s11_s24, 16, %s518_s26, [#allocation2] }
  0x13   :  { %483 = dma.done.wait [#allocation2], 32 }
  0x14   :  { %484 = vsyncadd [#allocation2], 4294967264 }
  0x15   :  { %15 = sfence }
  0x16   :  { %16 = vsyncpa [#allocation6], 0 }
  0x17   :  { %18 = vsyncpa [#allocation6 + $0x1], 0 }
  0x18   :  { %19 = vsyncpa [#allocation7], 0 }
  0x19   :  { %21 = vsyncpa [#allocation7 + $0x1], 0  ;;  %s562_s0 = smov 0   ;;  %s564_s1 = smov 0  }
  0x1a   :  { %s566_s27 = smov 0   ;;  %s568_s28 = smov 0  }
  0x1b   :  { %s570_s29 = smov 0   ;;  %s572_s30 = smov 0  }
  0x1c LB: > { %s296_s4 = sadd.s32 4294967295, %s515_s30   ;;  %s297_s5 = sadd.s32 4294967294, %s515_s30   ;;  %s515_s30 = sphi %s572_s30, %s27_s30   ;;  %s511_s29 = sphi %s570_s29, %s751_s29   ;;  %s507_s28 = sphi %s568_s28, %s750_s28   ;;  %s503_s27 = sphi %s566_s27, %s749_s27   ;;  %s499_s1 = sphi %s564_s1, %s748_s1   ;;  %s495_s0 = sphi %s562_s0, %s747_s0  }
  0x1d   : > { %s42_s6 = sadd.s32 1, %s511_s29  ;;  %s57_s7 = sadd.s32 1, %s503_s27 }
  0x1e   : > { %p44_p8 = scmp.ge.s32.totalorder %s42_s6, 4  ;;  %p64_p9 = scmp.ne.s32.totalorder %s503_s27, %s499_s1 }
  0x1f   : > { %p65_p10 = scmp.eq.s32.totalorder %s515_s30, 0  ;;  %p70_p11 = scmp.ne.s32.totalorder %s499_s1, %s495_s0 }
  0x20   : > { %s753_s6 = smov (%p44_p8, %s42_s6), 0  ;;  %p71_p13 = scmp.eq.s32.totalorder %s296_s4, 0 }
  0x21   : > { %p603_p12 = por %p65_p10, %p64_p9  ;;  %s51_s9 = ssub.s32 %s511_s29, %s753_s6 }
  0x22   : > { %p98_p0 = scmp.eq.s32.totalorder %s296_s4, 3  ;;  %p55_p1 = scmp.eq.s32.totalorder %s51_s9, 0 }
  0x23   : > { %p609_p2 = por %p71_p13, %p70_p11  ;;  %p104_p4 = scmp.eq.s32.totalorder %s297_s5, 3 }
  0x24   : > { %p613_p3 = por %p98_p0, %p64_p9  ;;  %p321_p6 = scmp.lt.s32.totalorder %s515_s30, 4 }
  0x25   : > { %s618_s12 = scalar_select %p55_p1, %s503_s27, %s57_s7  }
  0x26   : > { %s742_s11 = scalar_select %p613_p3, 1, 0 }
  0x27   : > { %p620_p5 = por %p104_p4, %p70_p11  ;;  %s124_s14 = sand.u32 1, %s503_s27  }
  0x28   : > { %s300_s15 = sshll.u32 %s124_s14, 2  ;;  %s301_s16 = sshll.u32 %s511_s29, 5 }
  0x29   : > { %s743_s13 = scalar_select %p620_p5, 1, 0 }
  0x2a   : > { %s630_s19 = scalar_lea.hbm %s736_s2, %s301_s16  ;;  %s128_s20 = scalar_lea.vmem [#allocation5], %s300_s15 }
  0x2b   : > { %s138_s21 = sshll.u32 %s128_s20, 4  ;;  %p636_p7 = pnand %p321_p6, %p603_p12  ;;  %s632_s21 = int_to_ptr.vmem [resolvable:$true] %s138_s21 }
  0x2c   : > { %s640_s23 = scalar_lea.sflag [#allocation6], %s124_s14  ;;  %s401_s24 = scalar_lea.hbm %s630_s19, 64 }
  0x2d   : > { %p402_p8 = scmp.ne.s32.totalorder %s630_s19, %s401_s24  ;;  %p403_p9 = pneg %p636_p7 }
  0x2e   : > { %s406_s4 = scalar_lea.hbm %s736_s2, 256  ;;  %p407_p12 = scmp.lt.u32.totalorder %s630_s19, %s736_s2 }
  0x2f   : > { %p404_p10 = pnand %p403_p9, %p402_p8  ;;  %p408_p13 = scmp.lt.u32.totalorder %s406_s4, %s401_s24 }
  0x30   : > { %p410_p1 = scmp.lt.u32.totalorder %s401_s24, %s630_s19 }
  0x31   : > { %p405_p11 = pneg %p404_p10  ;;  %p409_p0 = por %p408_p13, %p407_p12 }
  0x33   : > { %p411_p4 = por %p410_p1, %p409_p0 }
  0x35   : > { %p412_p6 = pnand %p411_p4, %p405_p11 }
  0x37   : > { %415 = shalt.err (!%p412_p6)
}
  0x38   : > { %s416_s8 = scalar_lea.vmem %s632_s21, 64  ;;  %s519_s9 = smov [#allocation5]  }
  0x39   : > { %p417_p8 = scmp.ne.s32.totalorder %s632_s21, %s416_s8  ;;  %s421_s14 = sshll.u32 %s519_s9, 4  ;;  %s422_s14 = int_to_ptr.vmem [resolvable:$false] %s421_s14 }
  0x3a   : > { %s423_s15 = scalar_lea.vmem %s422_s14, 128  ;;  %p424_p3 = scmp.lt.s32.totalorder %s632_s21, %s422_s14 }
  0x3b   : > { %p419_p10 = pnand %p417_p8, %p403_p9  ;;  %p425_p12 = scmp.lt.s32.totalorder %s423_s15, %s416_s8 }
  0x3d   : > { %p420_p5 = pneg %p419_p10  ;;  %p426_p13 = por %p425_p12, %p424_p3 }
  0x3f   : > { %p427_p0 = pnand %p426_p13, %p420_p5 }
  0x41   : > { %430 = shalt.err (!%p427_p0)
}
  0x42   : > { %s520_s16 = smov 128   ;;  %s521_s17 = smov 32  }
  0x43   : > { %s522_s18 = smov 2   ;;  %p302_p9 = scmp.ge.s32.totalorder %s515_s30, 1 }
  0x44   : > { %316 = dma.hbm_to_vmem [thread:$0]  (!%p636_p7), %s630_s19, 64, %s632_s21, %s640_s23, %s520_s16, %s521_s17, %s522_s18  }
  0x45   : > { %p146_p11 = scmp.lt.s32.totalorder %s515_s30, 5 }
  0x47   : > { %p147_p1 = pnand %p302_p9, %p146_p11 }
  0x48   : > { %s671_s20 = sand.u32 (!%p147_p1), 1, %s499_s1  }
  0x49   : > { %150 = sbr.rel (%p147_p1) target bundleno = 110 (0x6e), region = 24  ;;  %s303_s24 = sshll.u32 (!%p147_p1), %s671_s20, 2 }
  0x4a   : > { %s153_s25 = scalar_lea.sflag (!%p147_p1), [#allocation6], %s671_s20  ;;  %s156_s26 = scalar_lea.vmem (!%p147_p1), [#allocation5], %s303_s24 }
  0x50   : > { %486 = dma.done.wait (%p609_p2), %s153_s25, 64  }
  0x51   : > { %488 = vsyncadd (%p609_p2), %s153_s25, 4294967232  ;;  %s177_s19 = sld [smem:[#allocation3 + %s507_s28]]  ;;  %s174_s22 = scalar_lea.vmem [#allocation8], %s303_s24  ;;  %v179_v0 = vld [vmem:[%s156_s26] sm:$0x3] }
  0x52   : > { %s178_s21 = sld [smem:[#allocation4 + %s507_s28]]  ;;  %s206_s23 = sshll.u32 %s174_s22, 4  ;;  %v180_v3 = vld [vmem:[%s156_s26 + $0x2] sm:$0x3]  ;;  %s682_s23 = int_to_ptr.vmem [resolvable:$true] %s206_s23 }
  0x53   : > { %s306_s4 = sshll.u32 %s507_s28, 5  ;;  %s190_s28 = scalar_lea.sflag [#allocation7], %s671_s20 }
  0x54   : > { %s687_s7 = scalar_lea.hbm %s737_s3, %s306_s4  ;;  %s431_s8 = scalar_lea.vmem %s682_s23, 64 }
  0x55   : > { %p432_p2 = scmp.ne.s32.totalorder %s682_s23, %s431_s8  ;;  %p745_p3 = scmp.ne.s32.totalorder %s742_s11, 0 }
  0x56   : > { %s523_s9 = smov [#allocation8]  }
  0x57   : > { %v181_v1 = vstv %s177_s19  ;;  %p433_p5 = pnand %p432_p2, %p745_p3  ;;  %s435_s14 = sshll.u32 %s523_s9, 4  ;;  %s436_s14 = int_to_ptr.vmem [resolvable:$false] %s435_s14 }
  0x58   : > { %v184_v2 = vstv %s178_s21  ;;  %v182_v4 = vsub.f32 %v179_v0, %v181_v1  ;;  %v183_v5 = vsub.f32 %v180_v3, %v181_v1  ;;  %s437_s15 = scalar_lea.vmem %s436_s14, 128  ;;  %p438_p4 = scmp.lt.s32.totalorder %s682_s23, %s436_s14 }
  0x59   : > { %p434_p7 = pneg %p433_p5  ;;  %p439_p6 = scmp.lt.s32.totalorder %s437_s15, %s431_s8 }
  0x5a   : > { %v185_v6 = vmul.f32 %v184_v2, %v182_v4  ;;  %v186_v7 = vmul.f32 %v184_v2, %v183_v5 }
  0x5b   : > { %p440_p8 = por %p439_p6, %p438_p4 }
  0x5c   : > { %187 = vst [vmem:[%s174_s22] sm:$0x3] %v185_v6  ;;  %188 = vst [vmem:[%s174_s22 + $0x2] sm:$0x3] %v186_v7 }
  0x5d   : > { %p441_p10 = pnand %p440_p8, %p434_p7 }
  0x5f   : > { %444 = shalt.err (!%p441_p10)
}
  0x60   : > { %s445_s16 = scalar_lea.hbm %s687_s7, 64  ;;  %s449_s24 = scalar_lea.hbm %s737_s3, 256 }
  0x61   : > { %p446_p12 = scmp.ne.s32.totalorder %s687_s7, %s445_s16  ;;  %p450_p9 = scmp.lt.u32.totalorder %s687_s7, %s737_s3 }
  0x62   : > { %p451_p11 = scmp.lt.u32.totalorder %s449_s24, %s445_s16  ;;  %p453_p2 = scmp.lt.u32.totalorder %s445_s16, %s687_s7 }
  0x63   : > { %p447_p13 = pnand %p446_p12, %p745_p3 }
  0x64   : > { %p452_p1 = por %p451_p11, %p450_p9 }
  0x65   : > { %p448_p0 = pneg %p447_p13 }
  0x66   : > { %p454_p5 = por %p453_p2, %p452_p1 }
  0x68   : > { %p455_p7 = pnand %p454_p5, %p448_p0 }
  0x6a   : > { %458 = shalt.err (!%p455_p7)
}
  0x6b   : > { %s524_s19 = smov 32   ;;  %s525_s21 = smov 128  }
  0x6c   : > { %s526_s22 = smov 2  }
  0x6d   : > { %311 = dma.vmem_to_hbm [thread:$0]  (%p745_p3), %s682_s23, 64, %s687_s7, %s190_s28, %s524_s19, %s525_s21, %s526_s22  }
  0x6e PF: > { %p322_p4 = scmp.ge.s32.totalorder %s515_s30, 2  ;;  %s221_s4 = sand.u32 1, %s495_s0  }
  0x6f   : > { %p746_p6 = scmp.ne.s32.totalorder %s743_s13, 0  ;;  %s222_s10 = scalar_lea.sflag [#allocation7], %s221_s4 }
  0x71   : > { %p318_p8 = pnand %p322_p4, %p746_p6 }
  0x73   : > { %490 = dma.done.wait (!%p318_p8), %s222_s10, 64  }
  0x74   : > { %492 = vsyncadd (!%p318_p8), %s222_s10, 4294967232  ;;  %s27_s30 = sadd.s32 1, %s515_s30   ;;  %s747_s0 = smov %s499_s1 }
  0x75   : > { %p24_p10 = scmp.ge.s32.totalorder %s27_s30, 6   ;;  %s748_s1 = smov %s503_s27 }
  0x76   : > { %s749_s27 = smov %s618_s12  ;;  %s750_s28 = smov %s511_s29 }
  0x77   : > { %s751_s29 = smov %s753_s6  ;;  %26 = sbr.rel (!%p24_p10) target bundleno = 28 (0x1c), region = 69 }
  0x7e   :  { %227 = vsyncpa [#allocation6], 1 }
  0x7f   :  { %229 = vsyncpa [#allocation6 + $0x1], 1 }
  0x80   :  { %230 = vsyncpa [#allocation7], 1 }
  0x81   :  { %232 = vsyncpa [#allocation7 + $0x1], 1 }

</bundles_post_ra>
